<compile_context>
chip_gen: v7x
topology: tpu7x:2x2x1
jax: 0.10.0
libtpu: 0.0.40
codegen_flags: <defaults>
</compile_context>

<pallas_src>
import functools

import jax
import jax.numpy as jnp
from jax.experimental import pallas as pl
from jax.experimental.pallas import tpu as pltpu


# ---------------------------------------------------------------------------
# Glue helpers: constant matrices built once on host/XLA side.
# ---------------------------------------------------------------------------
def _bilinear_matrix_align_corners(n_out, n_in):
    """(n_out, n_in) matrix s.t. out = M @ in == 1-D linear resize, align_corners=True."""
    if n_in == 1:
        return jnp.ones((n_out, 1), jnp.float32)
    if n_out == 1:
        src = jnp.zeros((1,), jnp.float32)
    else:
        src = jnp.arange(n_out, dtype=jnp.float32) * ((n_in - 1) / (n_out - 1))
    i0 = jnp.clip(jnp.floor(src).astype(jnp.int32), 0, n_in - 2)
    frac = src - i0.astype(jnp.float32)
    return ((1.0 - frac)[:, None] * jax.nn.one_hot(i0, n_in, dtype=jnp.float32)
            + frac[:, None] * jax.nn.one_hot(i0 + 1, n_in, dtype=jnp.float32))


def _normalized_box_matrices(h, w, r):
    """Banded {0,1} box matrices pre-normalized by the clamped window counts.

    mean(z) over the (2r+1)^2 clamped window == bh_norm @ z @ bw_norm,
    since the window count N factorizes as cnt_h[i] * cnt_w[j].
    """
    ih = jnp.arange(h)
    bh = (jnp.abs(ih[:, None] - ih[None, :]) <= r).astype(jnp.float32)
    bh_norm = bh / bh.sum(axis=1, keepdims=True)          # rows scaled by 1/cnt_h
    iw = jnp.arange(w)
    bw = (jnp.abs(iw[:, None] - iw[None, :]) <= r).astype(jnp.float32)
    bw_norm = bw / bw.sum(axis=0, keepdims=True)          # cols scaled by 1/cnt_w
    return bh_norm, bw_norm


def _pick_tile_h(h_hr, target=512):
    """Row-tile for the high-res stage; keeps VMEM bounded on v7x (64 MiB)."""
    if h_hr <= target:
        return h_hr
    for d in range(target, 7, -1):
        if h_hr % d == 0 and d % 8 == 0:
            return d
    return h_hr  # fallback: single full-plane tile


# ---------------------------------------------------------------------------
# Pallas kernel: grid = (N, H_hr // tile_h).
#   Constants (bh, bw4, wh-tile, wwb) are resident inputs.
#   Low-res A/b slab computed once per n (t == 0) into persistent VMEM scratch.
# ---------------------------------------------------------------------------
def _guided_filter_kernel(bh_ref, bw4_ref, wh_ref, wwb_ref,
                          lrx_ref, lry_ref, hrx_ref, out_ref,
                          stk_ref, ab_ref, *, eps, cwl):
    t = pl.program_id(1)

    @pl.when(t == 0)
    def _():
        x = lrx_ref[...]                       # (H_lr, C*W_lr)
        y = lry_ref[...]                       # (H_lr, C*W_lr)
        # Stack the 4 box-filter inputs along lanes -> one wide MXU call.
        stk_ref[:, 0 * cwl:1 * cwl] = x
        stk_ref[:, 1 * cwl:2 * cwl] = y
        stk_ref[:, 2 * cwl:3 * cwl] = x * y
        stk_ref[:, 3 * cwl:4 * cwl] = x * x
        means = jnp.dot(
            jnp.dot(bh_ref[...], stk_ref[...], preferred_element_type=jnp.float32),
            bw4_ref[...], preferred_element_type=jnp.float32)   # (H_lr, 4*C*W_lr)
        mean_x = means[:, 0 * cwl:1 * cwl]
        mean_y = means[:, 1 * cwl:2 * cwl]
        mean_xy = means[:, 2 * cwl:3 * cwl]
        mean_xx = means[:, 3 * cwl:4 * cwl]
        cov_xy = mean_xy - mean_x * mean_y
        var_x = mean_xx - mean_x * mean_x
        a = cov_xy / (var_x + eps)             # exact divide (eps=1e-8 is tiny)
        b = mean_y - a * mean_x
        ab_ref[:, :cwl] = a                    # persists across H_hr row tiles
        ab_ref[:, cwl:] = b

    # Bilinear (align_corners=True) upsample of [A | b] for this row tile.
    ab_h = jnp.dot(wh_ref[...], ab_ref[...],
                   preferred_element_type=jnp.float32)          # (tile_h, 2*C*W_lr)
    mean_a = jnp.dot(ab_h[:, :cwl], wwb_ref[...],
                     preferred_element_type=jnp.float32)        # (tile_h, C*W_hr)
    mean_b = jnp.dot(ab_h[:, cwl:], wwb_ref[...],
                     preferred_element_type=jnp.float32)
    out_ref[...] = mean_a * hrx_ref[...] + mean_b


# ---------------------------------------------------------------------------
# Wrapper: reshapes, constant-matrix setup, pallas_call.
# ---------------------------------------------------------------------------
def fast_guided_filter(lr_x, lr_y, hr_x, r, eps=1e-8):
    n_lrx, c_lrx, h_lr, w_lr = lr_x.shape
    n_lry, c_lry, h_lry, w_lry = lr_y.shape
    n_hrx, c_hrx, h_hr, w_hr = hr_x.shape
    assert n_lrx == n_lry == n_hrx
    assert c_lrx == c_hrx and (c_lrx == 1 or c_lrx == c_lry)
    assert h_lr == h_lry and w_lr == w_lry
    assert h_lr > 2 * r + 1 and w_lr > 2 * r + 1

    n = n_lrx
    if c_lrx == 1 and c_lry > 1:
        lr_x = jnp.broadcast_to(lr_x, (n, c_lry, h_lr, w_lr))
        hr_x = jnp.broadcast_to(hr_x, (n, c_lry, h_hr, w_hr))
    c = c_lry

    cwl = c * w_lr        # low-res lane width
    cwh = c * w_hr        # high-res lane width

    # Lane-dense slabs: (N, H, C*W) with channel outer, width inner along lanes.
    def to_slab(a, h, w):
        return jnp.transpose(a, (0, 2, 1, 3)).reshape(n, h, c * w).astype(jnp.float32)

    lrx_s = to_slab(lr_x, h_lr, w_lr)
    lry_s = to_slab(lr_y, h_lr, w_lr)
    hrx_s = to_slab(hr_x, h_hr, w_hr)

    # Constant matrices (built once, resident in VMEM across the whole grid).
    bh_norm, bw_norm = _normalized_box_matrices(h_lr, w_lr, r)
    bw4 = jnp.kron(jnp.eye(4 * c, dtype=jnp.float32), bw_norm)   # (4*C*W_lr, 4*C*W_lr)
    wh = _bilinear_matrix_align_corners(h_hr, h_lr)              # (H_hr, H_lr)
    ww_t = _bilinear_matrix_align_corners(w_hr, w_lr).T          # (W_lr, W_hr)
    wwb = jnp.kron(jnp.eye(c, dtype=jnp.float32), ww_t)          # (C*W_lr, C*W_hr)

    tile_h = _pick_tile_h(h_hr)
    num_t = h_hr // tile_h

    # Cost estimate (low-res stage dominates flops, high-res stage dominates bytes).
    flops_box = 2 * h_lr * h_lr * (4 * cwl) + 2 * h_lr * (4 * cwl) * (4 * cwl)
    flops_up = 2 * tile_h * h_lr * (2 * cwl) + 2 * 2 * tile_h * cwl * cwh
    flops = n * (flops_box + num_t * flops_up + 2 * h_hr * cwh)
    bytes_accessed = 4 * n * (2 * h_lr * cwl + 2 * h_hr * cwh)
    cost = pl.CostEstimate(flops=int(flops), transcendentals=0,
                           bytes_accessed=int(bytes_accessed))

    # VMEM budget: resident constants + double-buffered blocks + scratch (+ margin).
    f32b = 4
    consts_b = f32b * (h_lr * h_lr + (4 * cwl) ** 2 + cwl * cwh)
    blocks_b = f32b * (2 * tile_h * h_lr + 4 * h_lr * cwl + 4 * tile_h * cwh)
    scratch_b = f32b * (h_lr * 4 * cwl + h_lr * 2 * cwl)
    vmem_limit = int(min(max(2 * consts_b + blocks_b + scratch_b + (4 << 20),
                             32 << 20), 64 << 20))

    kernel = functools.partial(_guided_filter_kernel, eps=float(eps), cwl=cwl)
    out_slab = pl.pallas_call(
        kernel,
        out_shape=jax.ShapeDtypeStruct((n, h_hr, cwh), jnp.float32),
        grid=(n, num_t),
        in_specs=[
            pl.BlockSpec((h_lr, h_lr), lambda i, t: (0, 0)),          # bh_norm
            pl.BlockSpec((4 * cwl, 4 * cwl), lambda i, t: (0, 0)),    # kron(I_4C, bw)
            pl.BlockSpec((tile_h, h_lr), lambda i, t: (t, 0)),        # wh row tile
            pl.BlockSpec((cwl, cwh), lambda i, t: (0, 0)),            # kron(I_C, ww^T)
            pl.BlockSpec((None, h_lr, cwl), lambda i, t: (i, 0, 0)),  # lr_x slab
            pl.BlockSpec((None, h_lr, cwl), lambda i, t: (i, 0, 0)),  # lr_y slab
            pl.BlockSpec((None, tile_h, cwh), lambda i, t: (i, t, 0)),  # hr_x tile
        ],
        out_specs=pl.BlockSpec((None, tile_h, cwh), lambda i, t: (i, t, 0)),
        scratch_shapes=[
            pltpu.VMEM((h_lr, 4 * cwl), jnp.float32),   # stacked box inputs
            pltpu.VMEM((h_lr, 2 * cwl), jnp.float32),   # [A | b] low-res slab
        ],
        compiler_params=pltpu.CompilerParams(
            dimension_semantics=("parallel", "arbitrary"),
            vmem_limit_bytes=vmem_limit),
        cost_estimate=cost,
    )(bh_norm, bw4, wh, wwb, lrx_s, lry_s, hrx_s)

    # (N, H_hr, C*W_hr) -> NCHW
    return jnp.transpose(out_slab.reshape(n, h_hr, c, w_hr), (0, 2, 1, 3))


# ---------------------------------------------------------------------------
# Pure-JAX reference (mirrors the PyTorch code) for correctness checking.
# ---------------------------------------------------------------------------
def _diff_x(inp, r):
    left = inp[:, :, r:2 * r + 1]
    middle = inp[:, :, 2 * r + 1:] - inp[:, :, :-2 * r - 1]
    right = inp[:, :, -1:] - inp[:, :, -2 * r - 1:-r - 1]
    return jnp.concatenate([left, middle, right], axis=2)


def _diff_y(inp, r):
    left = inp[:, :, :, r:2 * r + 1]
    middle = inp[:, :, :, 2 * r + 1:] - inp[:, :, :, :-2 * r - 1]
    right = inp[:, :, :, -1:] - inp[:, :, :, -2 * r - 1:-r - 1]
    return jnp.concatenate([left, middle, right], axis=3)


def _boxfilter(x, r):
    return _diff_y(_diff_x(jnp.cumsum(x, axis=2), r).cumsum(axis=3), r)


def _reference(lr_x, lr_y, hr_x, r, eps):
    n, _, h_lr, w_lr = lr_x.shape
    _, _, h_hr, w_hr = hr_x.shape
    ones = jnp.ones((1, 1, h_lr, w_lr), jnp.float32)
    nbox = _boxfilter(ones, r)
    mean_x = _boxfilter(lr_x, r) / nbox
    mean_y = _boxfilter(lr_y, r) / nbox
    cov_xy = _boxfilter(lr_x * lr_y, r) / nbox - mean_x * mean_y
    var_x = _boxfilter(lr_x * lr_x, r) / nbox - mean_x * mean_x
    a = cov_xy / (var_x + eps)
    b = mean_y - a * mean_x
    wh = _bilinear_matrix_align_corners(h_hr, h_lr)
    ww = _bilinear_matrix_align_corners(w_hr, w_lr)
    mean_a = jnp.einsum('Hh,nchw,Ww->ncHW', wh, a, ww)
    mean_b = jnp.einsum('Hh,nchw,Ww->ncHW', wh, b, ww)
    return mean_a * hr_x + mean_b


if __name__ == "__main__":
    key = jax.random.PRNGKey(0)
    k1, k2, k3 = jax.random.split(key, 3)

    N, C = 2, 4
    H_LR, W_LR = 16, 16
    H_HR, W_HR = 32, 32
    R, EPS = 2, 1e-8

    lr_x = jax.random.uniform(k1, (N, C, H_LR, W_LR), jnp.float32)
    lr_y = jax.random.uniform(k2, (N, C, H_LR, W_LR), jnp.float32)
    hr_x = jax.random.uniform(k3, (N, C, H_HR, W_HR), jnp.float32)

    out = fast_guided_filter(lr_x, lr_y, hr_x, R, EPS)
    out = jax.block_until_ready(out)

    ref = _reference(lr_x, lr_y, hr_x, R, EPS)
    assert out.shape == (N, C, H_HR, W_HR), out.shape
    assert jnp.allclose(out, ref, atol=1e-3, rtol=1e-3), float(
        jnp.max(jnp.abs(out - ref)))

    print("KERNEL_OK")
</pallas_src>

<mosaic_0001>
module attributes {stable_mosaic.version = 11 : i64} {
  func.func @_guided_filter_kernel(%arg0: i32, %arg1: i32, %arg2: memref<16x16xf32, #tpu.memory_space<vmem>>, %arg3: memref<256x256xf32, #tpu.memory_space<vmem>>, %arg4: memref<32x16xf32, #tpu.memory_space<vmem>>, %arg5: memref<64x128xf32, #tpu.memory_space<vmem>>, %arg6: memref<1x16x64xf32, #tpu.memory_space<vmem>>, %arg7: memref<1x16x64xf32, #tpu.memory_space<vmem>>, %arg8: memref<1x32x128xf32, #tpu.memory_space<vmem>>, %arg9: memref<1x32x128xf32, #tpu.memory_space<vmem>>, %arg10: memref<16x256xf32, #tpu.memory_space<vmem>>, %arg11: memref<16x128xf32, #tpu.memory_space<vmem>>) attributes {dimension_semantics = [#tpu.dimension_semantics<parallel>, #tpu.dimension_semantics<arbitrary>], iteration_bounds = array<i64: 2, 1>, scalar_prefetch = 0 : i64, scratch_operands = 2 : i64, tpu.core_type = #tpu.core_type<tc>, window_params = [{pipeline_mode = #tpu.pipeline_mode<synchronous>, transform_indices = @transform_0, window_bounds = array<i64: 16, 16>}, {pipeline_mode = #tpu.pipeline_mode<synchronous>, transform_indices = @transform_1, window_bounds = array<i64: 256, 256>}, {transform_indices = @transform_2, window_bounds = array<i64: 32, 16>}, {pipeline_mode = #tpu.pipeline_mode<synchronous>, transform_indices = @transform_3, window_bounds = array<i64: 64, 128>}, {transform_indices = @transform_4, window_bounds = array<i64: 1, 16, 64>}, {transform_indices = @transform_5, window_bounds = array<i64: 1, 16, 64>}, {transform_indices = @transform_6, window_bounds = array<i64: 1, 32, 128>}, {transform_indices = @transform_7, window_bounds = array<i64: 1, 32, 128>}]} {
    %c0_i32 = arith.constant 0 : i32
    %0 = arith.cmpi eq, %arg1, %c0_i32 : i32
    %1 = arith.extui %0 : i1 to i32
    %c0_i32_0 = arith.constant 0 : i32
    %2 = arith.cmpi ne, %1, %c0_i32_0 : i32
    scf.if %2 {
      %c0_16 = arith.constant 0 : index
      %c0_17 = arith.constant 0 : index
      %c0_18 = arith.constant 0 : index
      %19 = vector.load %arg6[%c0_16, %c0_17, %c0_18] : memref<1x16x64xf32, #tpu.memory_space<vmem>>, vector<1x16x64xf32>
      %20 = vector.shape_cast %19 : vector<1x16x64xf32> to vector<16x64xf32>
      %c0_19 = arith.constant 0 : index
      %c0_20 = arith.constant 0 : index
      %c0_21 = arith.constant 0 : index
      %21 = vector.load %arg7[%c0_19, %c0_20, %c0_21] : memref<1x16x64xf32, #tpu.memory_space<vmem>>, vector<1x16x64xf32>
      %22 = vector.shape_cast %21 : vector<1x16x64xf32> to vector<16x64xf32>
      %c0_22 = arith.constant 0 : index
      %c0_23 = arith.constant 0 : index
      %23 = vector.load %arg10[%c0_22, %c0_23] : memref<16x256xf32, #tpu.memory_space<vmem>>, vector<16x64xf32>
      tpu.vector_store %arg10[%c0_22, %c0_23], %20 {strides = array<i32>} : memref<16x256xf32, #tpu.memory_space<vmem>>, vector<16x64xf32>,
      %c0_24 = arith.constant 0 : index
      %c64 = arith.constant 64 : index
      %24 = vector.load %arg10[%c0_24, %c64] : memref<16x256xf32, #tpu.memory_space<vmem>>, vector<16x64xf32>
      tpu.vector_store %arg10[%c0_24, %c64], %22 {strides = array<i32>} : memref<16x256xf32, #tpu.memory_space<vmem>>, vector<16x64xf32>,
      %25 = arith.mulf %20, %22 : vector<16x64xf32>
      %c0_25 = arith.constant 0 : index
      %c128 = arith.constant 128 : index
      %26 = vector.load %arg10[%c0_25, %c128] : memref<16x256xf32, #tpu.memory_space<vmem>>, vector<16x64xf32>
      tpu.vector_store %arg10[%c0_25, %c128], %25 {strides = array<i32>} : memref<16x256xf32, #tpu.memory_space<vmem>>, vector<16x64xf32>,
      %27 = arith.mulf %20, %20 : vector<16x64xf32>
      %c0_26 = arith.constant 0 : index
      %c192 = arith.constant 192 : index
      %28 = vector.load %arg10[%c0_26, %c192] : memref<16x256xf32, #tpu.memory_space<vmem>>, vector<16x64xf32>
      tpu.vector_store %arg10[%c0_26, %c192], %27 {strides = array<i32>} : memref<16x256xf32, #tpu.memory_space<vmem>>, vector<16x64xf32>,
      %c0_27 = arith.constant 0 : index
      %c0_28 = arith.constant 0 : index
      %29 = vector.load %arg2[%c0_27, %c0_28] : memref<16x16xf32, #tpu.memory_space<vmem>>, vector<16x16xf32>
      %c0_29 = arith.constant 0 : index
      %c0_30 = arith.constant 0 : index
      %30 = vector.load %arg10[%c0_29, %c0_30] : memref<16x256xf32, #tpu.memory_space<vmem>>, vector<16x256xf32>
      %cst_31 = arith.constant dense<0.000000e+00> : vector<16x256xf32>
      %31 = tpu.matmul %29, %30, %cst_31 {dimension_numbers = #tpu.dot_dimension_numbers<[1], [0], [0], [1], [0, 0, 1, 1], [], []>} : vector<16x16xf32>, vector<16x256xf32>, vector<16x256xf32> -> vector<16x256xf32>
      %c0_32 = arith.constant 0 : index
      %c0_33 = arith.constant 0 : index
      %32 = vector.load %arg3[%c0_32, %c0_33] : memref<256x256xf32, #tpu.memory_space<vmem>>, vector<256x256xf32>
      %cst_34 = arith.constant dense<0.000000e+00> : vector<16x256xf32>
      %33 = tpu.matmul %31, %32, %cst_34 {dimension_numbers = #tpu.dot_dimension_numbers<[1], [0], [0], [1], [0, 0, 1, 1], [], []>} : vector<16x256xf32>, vector<256x256xf32>, vector<16x256xf32> -> vector<16x256xf32>
      %34 = vector.extract_strided_slice %33 {offsets = [0, 0], sizes = [16, 64], strides = [1, 1]} : vector<16x256xf32> to vector<16x64xf32>
      %35 = vector.extract_strided_slice %33 {offsets = [0, 64], sizes = [16, 64], strides = [1, 1]} : vector<16x256xf32> to vector<16x64xf32>
      %36 = vector.extract_strided_slice %33 {offsets = [0, 128], sizes = [16, 64], strides = [1, 1]} : vector<16x256xf32> to vector<16x64xf32>
      %37 = vector.extract_strided_slice %33 {offsets = [0, 192], sizes = [16, 64], strides = [1, 1]} : vector<16x256xf32> to vector<16x64xf32>
      %38 = arith.mulf %34, %35 : vector<16x64xf32>
      %39 = arith.subf %36, %38 : vector<16x64xf32>
      %40 = arith.mulf %34, %34 : vector<16x64xf32>
      %41 = arith.subf %37, %40 : vector<16x64xf32>
      %cst_35 = arith.constant 9.99999993E-9 : f32
      %42 = vector.broadcast %cst_35 : f32 to vector<16x64xf32>
      %43 = arith.addf %41, %42 : vector<16x64xf32>
      %44 = arith.divf %39, %43 : vector<16x64xf32>
      %45 = arith.mulf %44, %34 : vector<16x64xf32>
      %46 = arith.subf %35, %45 : vector<16x64xf32>
      %c0_36 = arith.constant 0 : index
      %c0_37 = arith.constant 0 : index
      %47 = vector.load %arg11[%c0_36, %c0_37] : memref<16x128xf32, #tpu.memory_space<vmem>>, vector<16x64xf32>
      tpu.vector_store %arg11[%c0_36, %c0_37], %44 {strides = array<i32>} : memref<16x128xf32, #tpu.memory_space<vmem>>, vector<16x64xf32>,
      %c0_38 = arith.constant 0 : index
      %c64_39 = arith.constant 64 : index
      %48 = vector.load %arg11[%c0_38, %c64_39] : memref<16x128xf32, #tpu.memory_space<vmem>>, vector<16x64xf32>
      tpu.vector_store %arg11[%c0_38, %c64_39], %46 {strides = array<i32>} : memref<16x128xf32, #tpu.memory_space<vmem>>, vector<16x64xf32>,
    } else {
    }
    %c0 = arith.constant 0 : index
    %c0_1 = arith.constant 0 : index
    %3 = vector.load %arg4[%c0, %c0_1] : memref<32x16xf32, #tpu.memory_space<vmem>>, vector<32x16xf32>
    %c0_2 = arith.constant 0 : index
    %c0_3 = arith.constant 0 : index
    %4 = vector.load %arg11[%c0_2, %c0_3] : memref<16x128xf32, #tpu.memory_space<vmem>>, vector<16x128xf32>
    %cst = arith.constant dense<0.000000e+00> : vector<32x128xf32>
    %5 = tpu.matmul %3, %4, %cst {dimension_numbers = #tpu.dot_dimension_numbers<[1], [0], [0], [1], [0, 0, 1, 1], [], []>} : vector<32x16xf32>, vector<16x128xf32>, vector<32x128xf32> -> vector<32x128xf32>
    %6 = vector.extract_strided_slice %5 {offsets = [0, 0], sizes = [32, 64], strides = [1, 1]} : vector<32x128xf32> to vector<32x64xf32>
    %c0_4 = arith.constant 0 : index
    %c0_5 = arith.constant 0 : index
    %7 = vector.load %arg5[%c0_4, %c0_5] : memref<64x128xf32, #tpu.memory_space<vmem>>, vector<64x128xf32>
    %cst_6 = arith.constant dense<0.000000e+00> : vector<32x128xf32>
    %8 = tpu.matmul %6, %7, %cst_6 {dimension_numbers = #tpu.dot_dimension_numbers<[1], [0], [0], [1], [0, 0, 1, 1], [], []>} : vector<32x64xf32>, vector<64x128xf32>, vector<32x128xf32> -> vector<32x128xf32>
    %9 = vector.extract_strided_slice %5 {offsets = [0, 64], sizes = [32, 64], strides = [1, 1]} : vector<32x128xf32> to vector<32x64xf32>
    %c0_7 = arith.constant 0 : index
    %c0_8 = arith.constant 0 : index
    %10 = vector.load %arg5[%c0_7, %c0_8] : memref<64x128xf32, #tpu.memory_space<vmem>>, vector<64x128xf32>
    %cst_9 = arith.constant dense<0.000000e+00> : vector<32x128xf32>
    %11 = tpu.matmul %9, %10, %cst_9 {dimension_numbers = #tpu.dot_dimension_numbers<[1], [0], [0], [1], [0, 0, 1, 1], [], []>} : vector<32x64xf32>, vector<64x128xf32>, vector<32x128xf32> -> vector<32x128xf32>
    %c0_10 = arith.constant 0 : index
    %c0_11 = arith.constant 0 : index
    %c0_12 = arith.constant 0 : index
    %12 = vector.load %arg8[%c0_10, %c0_11, %c0_12] : memref<1x32x128xf32, #tpu.memory_space<vmem>>, vector<1x32x128xf32>
    %13 = vector.shape_cast %12 : vector<1x32x128xf32> to vector<32x128xf32>
    %14 = arith.mulf %8, %13 : vector<32x128xf32>
    %15 = arith.addf %14, %11 : vector<32x128xf32>
    %c0_13 = arith.constant 0 : index
    %c0_14 = arith.constant 0 : index
    %c0_15 = arith.constant 0 : index
    %16 = vector.load %arg9[%c0_13, %c0_14, %c0_15] : memref<1x32x128xf32, #tpu.memory_space<vmem>>, vector<1x32x128xf32>
    %17 = vector.shape_cast %16 : vector<1x32x128xf32> to vector<32x128xf32>
    %18 = vector.shape_cast %15 : vector<32x128xf32> to vector<1x32x128xf32>
    tpu.vector_store %arg9[%c0_13, %c0_14, %c0_15], %18 {strides = array<i32>} : memref<1x32x128xf32, #tpu.memory_space<vmem>>, vector<1x32x128xf32>,
    return
  }
  func.func @transform_0(%arg0: i32, %arg1: i32) -> (i32, i32) {
    %c0_i32 = arith.constant 0 : i32
    %c0_i32_0 = arith.constant 0 : i32
    %c0_i32_1 = arith.constant 0 : i32
    return %c0_i32, %c0_i32_0 : i32, i32
  }
  func.func @transform_1(%arg0: i32, %arg1: i32) -> (i32, i32) {
    %c0_i32 = arith.constant 0 : i32
    %c0_i32_0 = arith.constant 0 : i32
    %c0_i32_1 = arith.constant 0 : i32
    return %c0_i32, %c0_i32_0 : i32, i32
  }
  func.func @transform_2(%arg0: i32, %arg1: i32) -> (i32, i32) {
    %c0_i32 = arith.constant 0 : i32
    %c0_i32_0 = arith.constant 0 : i32
    return %arg1, %c0_i32 : i32, i32
  }
  func.func @transform_3(%arg0: i32, %arg1: i32) -> (i32, i32) {
    %c0_i32 = arith.constant 0 : i32
    %c0_i32_0 = arith.constant 0 : i32
    %c0_i32_1 = arith.constant 0 : i32
    return %c0_i32, %c0_i32_0 : i32, i32
  }
  func.func @transform_4(%arg0: i32, %arg1: i32) -> (i32, i32, i32) {
    %c0_i32 = arith.constant 0 : i32
    %c0_i32_0 = arith.constant 0 : i32
    %c0_i32_1 = arith.constant 0 : i32
    return %arg0, %c0_i32, %c0_i32_0 : i32, i32, i32
  }
  func.func @transform_5(%arg0: i32, %arg1: i32) -> (i32, i32, i32) {
    %c0_i32 = arith.constant 0 : i32
    %c0_i32_0 = arith.constant 0 : i32
    %c0_i32_1 = arith.constant 0 : i32
    return %arg0, %c0_i32, %c0_i32_0 : i32, i32, i32
  }
  func.func @transform_6(%arg0: i32, %arg1: i32) -> (i32, i32, i32) {
    %c0_i32 = arith.constant 0 : i32
    %c0_i32_0 = arith.constant 0 : i32
    return %arg0, %arg1, %c0_i32 : i32, i32, i32
  }
  func.func @transform_7(%arg0: i32, %arg1: i32) -> (i32, i32, i32) {
    %c0_i32 = arith.constant 0 : i32
    %c0_i32_0 = arith.constant 0 : i32
    return %arg0, %arg1, %c0_i32 : i32, i32, i32
  }
}

</mosaic_0001>

<bundles_post_ra>
// kernel: tpu_custom_call.1
= control target key start
LH: loop header
LB: loop body
LE: loop exit
PB: predicated region body
PF: predicated region fallthrough
CT: control target
= control target key end

     0   :  { %s2299_s0 = inlined_call_operand.hbm [shape: f32[16,16], index: 0, kind: input, shape index: {}]   ;;  %s2300_s1 = inlined_call_operand.hbm [shape: f32[256,256], index: 1, kind: input, shape index: {}]   ;;  %s2301_s2 = inlined_call_operand.vmem [shape: f32[32,16], index: 2, kind: input, shape index: {}]   ;;  %s2302_s3 = inlined_call_operand.hbm [shape: f32[64,128], index: 3, kind: input, shape index: {}]   ;;  %s2303_s4 = inlined_call_operand.hbm [shape: f32[2,16,64], index: 4, kind: input, shape index: {}]   ;;  %s2304_s5 = inlined_call_operand.hbm [shape: f32[2,16,64], index: 5, kind: input, shape index: {}]   ;;  %s2305_s6 = inlined_call_operand.vmem [shape: f32[2,32,128], index: 6, kind: input, shape index: {}]   ;;  %s2306_s7 = inlined_call_operand.hbm [shape: f32[2,32,128], index: 7, kind: output, shape index: {}]  }
   0x1   :  { %2324 = sst [smem:[#allocation26_spill]] %s2300_s1 }
   0x2   :  { %2325 = sst [smem:[#allocation27_spill]] %s2303_s4 }
   0x3   :  { %2326 = sst [smem:[#allocation28_spill]] %s2306_s7 }
   0x4   :  { %12 = vsyncpa [#allocation5], 0 }
   0x5   :  { %13 = vsyncpa [#allocation8], 0 }
   0x6   :  { %14 = vsyncpa [#allocation11], 0 }
   0x7   :  { %16 = vsyncpa [#allocation11 + $0x1], 0 }
   0x8   :  { %17 = vsyncpa [#allocation6], 0 }
   0x9   :  { %19 = vsyncpa [#allocation6 + $0x1], 0  ;;  %s1919_s24 = smov 0   ;;  %s1921_s25 = smov 0  }
   0xa   :  { %s1923_s26 = smov 0   ;;  %s1925_s27 = smov 0  }
   0xb   :  { %s1927_s28 = smov 0   ;;  %s1929_s29 = smov 0  }
   0xc LB: > { %2327 = sst [smem:[#allocation18_spill]] %s1843_s24  ;;  %s1950_s30 = sadd.s32 4294967295, %s1863_s29   ;;  %s1863_s29 = sphi %s1929_s29, %s25_s29   ;;  %s1859_s28 = sphi %s1927_s28, %s2367_s28   ;;  %s1855_s27 = sphi %s1925_s27, %s2366_s27   ;;  %s1851_s26 = sphi %s1923_s26, %s2365_s26   ;;  %s1847_s25 = sphi %s1921_s25, %s2369_s25   ;;  %s1843_s24 = sphi %s1919_s24, %s2368_s24  }
   0xd   : > { %2328 = sst [smem:[#allocation19_spill]] %s1851_s26  ;;  %s1286_s8 = sadd.s32 4294967294, %s1863_s29  }
   0xe   : > { %2329 = sst [smem:[#allocation20_spill]] %s1859_s28  ;;  %p146_p0 = scmp.ne.s32.totalorder %s1847_s25, %s1843_s24 }
   0xf   : > { %2330 = sst [smem:[#allocation21_spill]] %s1863_s29  ;;  %p2307_p1 = scmp.eq.s32.totalorder %s1950_s30, 0 }
  0x10   : > { %p232_p3 = scmp.eq.s32.totalorder %s1286_s8, 1  ;;  %p1287_p5 = scmp.ge.s32.totalorder %s1863_s29, 1 }
  0x11   : > { %p1959_p4 = por %p2307_p1, %p146_p0  ;;  %p239_p7 = scmp.lt.s32.totalorder %s1863_s29, 3 }
  0x12   : > { %p1964_p6 = por %p232_p3, %p146_p0  ;;  %s1865_s12 = smov [#allocation7]  }
  0x13   : > { %s2331_s9 = scalar_select %p1959_p4, 1, 0 }
  0x14   : > { %s2332_s10 = scalar_select %p1964_p6, 1, 0 }
  0x15   : > { %p1969_p8 = pnand %p1287_p5, %p239_p7  ;;  %s264_s13 = sshll.u32 %s1865_s12, 4  ;;  %s265_s13 = int_to_ptr.vmem [resolvable:$true] %s264_s13 }
  0x16   : > { %2333 = sst [smem:[#allocation22_spill]] %s2332_s10  ;;  %s37_s15 = sadd.s32 1, %s1859_s28 }
  0x17   : > { %s2334_s11 = scalar_select %p1969_p8, 1, 0 }
  0x18   : > { %p1537_p9 = pneg %p1969_p8  ;;  %s2336_s1 = sld [smem:[#allocation26_spill]] }
  0x1a   : > { %p1978_p11 = pnand %p1537_p9, %p2307_p1 }
  0x1c   : > { %s2335_s14 = scalar_select %p1978_p11, 1, 0 }
  0x1d   : > { %p1991_p13 = pneg %p1978_p11 }
  0x1e   : > { %s1629_s18 = scalar_lea.hbm %s2336_s1, 8192 }
  0x1f   : > { %p1630_p12 = scmp.ne.s32.totalorder %s2336_s1, %s1629_s18  ;;  %p1636_p5 = scmp.lt.u32.totalorder %s1629_s18, %s2336_s1 }
  0x21   : > { %p1632_p0 = pnand %p1991_p13, %p1630_p12 }
  0x23   : > { %p1633_p3 = pneg %p1632_p0 }
  0x25   : > { %p1638_p7 = pnand %p1636_p5, %p1633_p3 }
  0x27   : > { %1641 = shalt.err (!%p1638_p7)
}
  0x28   : > { %s1642_s8 = scalar_lea.vmem %s265_s13, 8192  ;;  %p1650_p2 = scmp.lt.s32.totalorder %s265_s13, %s265_s13 }
  0x29   : > { %p1643_p9 = scmp.ne.s32.totalorder %s265_s13, %s1642_s8  ;;  %p1651_p6 = scmp.lt.s32.totalorder %s1642_s8, %s1642_s8 }
  0x2b   : > { %p1645_p10 = pnand %p1643_p9, %p1991_p13  ;;  %p1652_p4 = por %p1651_p6, %p1650_p2 }
  0x2d   : > { %p1646_p1 = pneg %p1645_p10 }
  0x2f   : > { %p1653_p8 = pnand %p1652_p4, %p1646_p1 }
  0x31   : > { %1656 = shalt.err (!%p1653_p8)
}
  0x32   : > { %s1866_s12 = smov 256   ;;  %s1867_s16 = smov 16  }
  0x33   : > { %1543 = dma.hbm_to_vmem [thread:$0]  (!%p1978_p11), %s2336_s1, 8192, %s265_s13, [#allocation8], %s1866_s12, %s1866_s12, %s1867_s16  }
  0x34   : > { %p39_p1 = scmp.ge.s32.totalorder %s37_s15, 2  ;;  %s133_s19 = sadd.s32 1, %s1851_s26 }
  0x35   : > { %p140_p2 = scmp.ne.s32.totalorder %s1851_s26, %s1847_s25  ;;  %p141_p4 = scmp.eq.s32.totalorder %s1863_s29, 0 }
  0x36   : > { %s2371_s15 = smov (%p39_p1, %s37_s15), 0  ;;  %p2340_p8 = scmp.eq.s32.totalorder %s1950_s30, 1 }
  0x37   : > { %2338 = sst [smem:[#allocation23_spill]] %s2371_s15  ;;  %p2013_p6 = por %p141_p4, %p140_p2 }
  0x38   : > { %p2019_p10 = por %p2340_p8, %p140_p2  ;;  %s130_s23 = ssub.s32 %s1859_s28, %s2371_s15 }
  0x39   : > { %p131_p12 = scmp.eq.s32.totalorder %s130_s23, 0  ;;  %p1561_p0 = scmp.lt.s32.totalorder %s1863_s29, 2 }
  0x3a   : > { %s2341_s22 = scalar_select %p2019_p10, 1, 0 }
  0x3b   : > { %s300_s13 = sand.u32 1, %s1863_s29   ;;  %s302_s12 = sand.u32 1, %s1851_s26  }
  0x3c   : > { %2342 = sst [smem:[#allocation24_spill]] %s2341_s22  ;;  %s2031_s16 = sshll.u32 %s302_s12, 4 }
  0x3d   : > { %s2028_s8 = scalar_select %p131_p12, %s1851_s26, %s133_s19  }
  0x3e   : > { %s1327_s17 = sshll.u32 %s1859_s28, 8  ;;  %s2344_s4 = sld [smem:[#allocation27_spill]] }
  0x3f   : > { %2343 = sst [smem:[#allocation25_spill]] %s2028_s8  ;;  %s304_s15 = scalar_lea.vmem [#allocation10], %s2031_s16 }
  0x40   : > { %s311_s23 = sshll.u32 %s304_s15, 4  ;;  %p2042_p3 = pnand %p1561_p0, %p2013_p6  ;;  %s2046_s23 = int_to_ptr.vmem [resolvable:$true] %s311_s23 }
  0x41   : > { %s2051_s1 = scalar_lea.hbm %s2304_s5, %s1327_s17  ;;  %s2053_s18 = scalar_lea.sflag [#allocation11], %s300_s13 }
  0x42   : > { %p2323_p7 = pneg %p2042_p3 }
  0x44   : > { %s2037_s10 = scalar_lea.hbm %s2344_s4, %s1327_s17  ;;  %s1662_s26 = scalar_lea.hbm %s2344_s4, 512 }
  0x45   : > { %s1657_s8 = scalar_lea.hbm %s2037_s10, 256  ;;  %p1663_p2 = scmp.lt.u32.totalorder %s2037_s10, %s2344_s4 }
  0x46   : > { %p1658_p5 = scmp.ne.s32.totalorder %s2037_s10, %s1657_s8  ;;  %p1664_p4 = scmp.lt.u32.totalorder %s1662_s26, %s1657_s8 }
  0x47   : > { %p1666_p8 = scmp.lt.u32.totalorder %s1657_s8, %s2037_s10 }
  0x48   : > { %p1660_p9 = pnand %p2323_p7, %p1658_p5  ;;  %p1665_p6 = por %p1664_p4, %p1663_p2 }
  0x4a   : > { %p1661_p1 = pneg %p1660_p9  ;;  %p1667_p12 = por %p1666_p8, %p1665_p6 }
  0x4c   : > { %p1668_p0 = pnand %p1667_p12, %p1661_p1 }
  0x4e   : > { %1671 = shalt.err (!%p1668_p0)
}
  0x4f   : > { %s1672_s28 = scalar_lea.vmem %s2046_s23, 256  ;;  %s1868_s13 = smov [#allocation10]  }
  0x50   : > { %p1673_p5 = scmp.ne.s32.totalorder %s2046_s23, %s1672_s28  ;;  %s1677_s17 = sshll.u32 %s1868_s13, 4  ;;  %s1678_s17 = int_to_ptr.vmem [resolvable:$false] %s1677_s17 }
  0x51   : > { %s1679_s24 = scalar_lea.vmem %s1678_s17, 512  ;;  %p1680_p11 = scmp.lt.s32.totalorder %s2046_s23, %s1678_s17 }
  0x52   : > { %p1675_p9 = pnand %p1673_p5, %p2323_p7  ;;  %p1681_p2 = scmp.lt.s32.totalorder %s1679_s24, %s1672_s28 }
  0x54   : > { %p1676_p10 = pneg %p1675_p9  ;;  %p1682_p4 = por %p1681_p2, %p1680_p11 }
  0x56   : > { %p1683_p6 = pnand %p1682_p4, %p1676_p10 }
  0x58   : > { %1686 = shalt.err (!%p1683_p6)
}
  0x59   : > { %s1869_s26 = smov 128   ;;  %s1870_s29 = smov 8  }
  0x5a   : > { %1550 = dma.hbm_to_vmem [thread:$0]  (!%p2042_p3), %s2037_s10, 256, %s2046_s23, %s2053_s18, %s1869_s26, %s1869_s26, %s1870_s29  }
  0x5b   : > { %s325_s8 = scalar_lea.vmem [#allocation12], %s2031_s16  ;;  %s1871_s15 = smov [#allocation4]  }
  0x5c   : > { %s332_s12 = sshll.u32 %s325_s8, 4  ;;  %s251_s20 = sshll.u32 %s1871_s15, 4  ;;  %s2085_s12 = int_to_ptr.vmem [resolvable:$true] %s332_s12  ;;  %s252_s20 = int_to_ptr.vmem [resolvable:$true] %s251_s20 }
  0x5d   : > { %s1872_s28 = smov [#allocation9]   ;;  %s1687_s4 = scalar_lea.hbm %s2299_s0, 256 }
  0x5e   : > { %s286_s13 = sshll.u32 %s1872_s28, 4  ;;  %p1688_p11 = scmp.ne.s32.totalorder %s2299_s0, %s1687_s4  ;;  %s2087_s13 = int_to_ptr.vmem [resolvable:$true] %s286_s13 }
  0x5f   : > { %p1694_p8 = scmp.lt.u32.totalorder %s1687_s4, %s2299_s0 }
  0x60   : > { %p1690_p10 = pnand %p1688_p11, %p1991_p13 }
  0x62   : > { %p1691_p1 = pneg %p1690_p10 }
  0x64   : > { %p1696_p12 = pnand %p1694_p8, %p1691_p1 }
  0x66   : > { %1699 = shalt.err (!%p1696_p12)
}
  0x67   : > { %s1700_s23 = scalar_lea.vmem %s252_s20, 256  ;;  %p1708_p2 = scmp.lt.s32.totalorder %s252_s20, %s252_s20 }
  0x68   : > { %p1701_p0 = scmp.ne.s32.totalorder %s252_s20, %s1700_s23  ;;  %p1709_p4 = scmp.lt.s32.totalorder %s1700_s23, %s1700_s23 }
  0x6a   : > { %p1703_p5 = pnand %p1701_p0, %p1991_p13  ;;  %p1710_p6 = por %p1709_p4, %p1708_p2 }
  0x6c   : > { %p1704_p9 = pneg %p1703_p5 }
  0x6e   : > { %p1711_p7 = pnand %p1710_p6, %p1704_p9 }
  0x70   : > { %1714 = shalt.err (!%p1711_p7)
}
  0x71   : > { %p2346_p11 = scmp.ne.s32.totalorder %s2335_s14, 0  ;;  %s1715_s15 = scalar_lea.hbm %s2302_s3, 1024 }
  0x72   : > { %p1716_p10 = scmp.ne.s32.totalorder %s2302_s3, %s1715_s15  ;;  %p1722_p8 = scmp.lt.u32.totalorder %s1715_s15, %s2302_s3 }
  0x73   : > { %1540 = dma.hbm_to_vmem [thread:$0]  (!%p2346_p11), %s2299_s0, 256, %s252_s20, [#allocation5], %s1869_s26, %s1869_s26, %s1870_s29  }
  0x74   : > { %p1718_p7 = pnand %p1716_p10, %p1991_p13 }
  0x76   : > { %p1719_p1 = pneg %p1718_p7 }
  0x78   : > { %p1724_p12 = pnand %p1722_p8, %p1719_p1 }
  0x7a   : > { %1727 = shalt.err (!%p1724_p12)
}
  0x7b   : > { %s1728_s20 = scalar_lea.vmem %s2087_s13, 1024  ;;  %p1736_p2 = scmp.lt.s32.totalorder %s2087_s13, %s2087_s13 }
  0x7c   : > { %p1729_p0 = scmp.ne.s32.totalorder %s2087_s13, %s1728_s20  ;;  %p1737_p4 = scmp.lt.s32.totalorder %s1728_s20, %s1728_s20 }
  0x7e   : > { %p1731_p5 = pnand %p1729_p0, %p1991_p13  ;;  %p1738_p6 = por %p1737_p4, %p1736_p2 }
  0x80   : > { %p1732_p9 = pneg %p1731_p5 }
  0x82   : > { %p1739_p10 = pnand %p1738_p6, %p1732_p9 }
  0x84   : > { %1742 = shalt.err (!%p1739_p10)
}
  0x85   : > { %1546 = dma.hbm_to_vmem [thread:$0]  (!%p2346_p11), %s2302_s3, 1024, %s2087_s13, [#allocation8], %s1869_s26, %s1869_s26, %s1870_s29  }
  0x86   : > { %s1743_s21 = scalar_lea.hbm %s2051_s1, 256  ;;  %p2347_p7 = pneg %p2042_p3 }
  0x87   : > { %p1744_p13 = scmp.ne.s32.totalorder %s2051_s1, %s1743_s21  ;;  %s1748_s4 = scalar_lea.hbm %s2304_s5, 512 }
  0x88   : > { %p1749_p12 = scmp.lt.u32.totalorder %s2051_s1, %s2304_s5  ;;  %p1750_p0 = scmp.lt.u32.totalorder %s1748_s4, %s1743_s21 }
  0x89   : > { %p1746_p1 = pnand %p1744_p13, %p2347_p7  ;;  %p1752_p9 = scmp.lt.u32.totalorder %s1743_s21, %s2051_s1 }
  0x8a   : > { %p1751_p5 = por %p1750_p0, %p1749_p12 }
  0x8b   : > { %p1747_p8 = pneg %p1746_p1 }
  0x8c   : > { %p1753_p2 = por %p1752_p9, %p1751_p5 }
  0x8e   : > { %p1754_p4 = pnand %p1753_p2, %p1747_p8 }
  0x90   : > { %1757 = shalt.err (!%p1754_p4)
}
  0x91   : > { %s1758_s13 = scalar_lea.vmem %s2085_s12, 256  ;;  %p2348_p6 = pmov %p2347_p7 }
  0x92   : > { %p1759_p11 = scmp.ne.s32.totalorder %s2085_s12, %s1758_s13  ;;  %s1873_s15 = smov [#allocation12]  }
  0x93   : > { %s1763_s28 = sshll.u32 %s1873_s15, 4  ;;  %s1764_s28 = int_to_ptr.vmem [resolvable:$false] %s1763_s28 }
  0x94   : > { %p1761_p10 = pnand %p1759_p11, %p2348_p6  ;;  %s1765_s17 = scalar_lea.vmem %s1764_s28, 512 }
  0x95   : > { %p1766_p7 = scmp.lt.s32.totalorder %s2085_s12, %s1764_s28  ;;  %p1767_p1 = scmp.lt.s32.totalorder %s1765_s17, %s1758_s13 }
  0x96   : > { %p1762_p13 = pneg %p1761_p10 }
  0x97   : > { %p1768_p12 = por %p1767_p1, %p1766_p7 }
  0x99   : > { %p1769_p0 = pnand %p1768_p12, %p1762_p13 }
  0x9b   : > { %1772 = shalt.err (!%p1769_p0)
}
  0x9c   : > { %1553 = dma.hbm_to_vmem [thread:$0]  (!%p2042_p3), %s2051_s1, 256, %s2085_s12, %s2053_s18, %s1869_s26, %s1869_s26, %s1870_s29  }
  0x9d   : > { %p2349_p8 = scmp.ne.s32.totalorder %s2334_s11, 0 }
  0x9e   : > { %p2350_p5 = scmp.eq.s32.totalorder (!%p2349_p8), %s1950_s30, 0 }
  0x9f   : > { %357 = sbr.rel (%p2349_p8) target bundleno = 1686 (0x696), region = 48 }
  0xa6   : > { %1826 = dma.done.wait (%p2350_p5), [#allocation5], 256   ;;  %p2351_p9 = pmov %p2350_p5 }
  0xa7   : > { %p2352_p2 = pmov %p2350_p5 }
  0xa8   : > { %1828 = vsyncadd (%p2351_p9), [#allocation5], 4294967040 }
  0xa9   : > { %1830 = dma.done.wait (%p2352_p2), [#allocation8], 9216   ;;  %p2353_p4 = pmov %p2352_p2 }
  0xaa   : > { %s371_s19 = sand.u32 1, %s1950_s30   ;;  %s2175_s1 = sand.u32 1, %s1847_s25  }
  0xab   : > { %1832 = vsyncadd (%p2353_p4), [#allocation8], 4294958080  ;;  %s1303_s11 = sshll.u32 %s2175_s1, 4  ;;  %s372_s18 = scalar_lea.sflag [#allocation11], %s371_s19 }
  0xac   : > { %s375_s26 = scalar_lea.vmem [#allocation10], %s1303_s11  ;;  %p2354_p3 = scmp.ne.s32.totalorder %s2331_s9, 0 }
  0xae   : > { %1834 = dma.done.wait (%p2354_p3), %s372_s18, 512  }
  0xaf   : > { %1836 = vsyncadd (%p2354_p3), %s372_s18, 4294966784  ;;  %vm459_vm0 = vcmask 523264   ;;  %s384_s29 = scalar_lea.vmem [#allocation12], %s1303_s11  ;;  %v455_v1 = vld [vmem:[%s375_s26] sm:$0xff]  ;;  %s1874_s12 = smov 64   ;;  %v456_v5 = vld [vmem:[%s375_s26 + $0x8] sm:$0xff] }
  0xb0   : > { %v457_v0 = vld [vmem:[%s384_s29] sm:$0xff]  ;;  %460 = vst.msk [vmem:[#allocation2] sm:$0xff] %vm459_vm0, %v455_v1  ;;  %v477_v3 = vmul.f32 %v455_v1, %v455_v1  ;;  %v458_v4 = vld [vmem:[%s384_s29 + $0x8] sm:$0xff]  ;;  %461 = vst.msk [vmem:[#allocation2 + $0x10] sm:$0xff] %vm459_vm0, %v456_v5  ;;  %v478_v7 = vmul.f32 %v456_v5, %v456_v5  ;;  %v1875_v8 = vmov 0.0   ;;  %vm470_vm1 = vcmask 1048064  }
  0xb1   : > { %464 = vrot.lane.b32.xlu1 %v457_v0, %s1874_s12  ;;  %v473_v2 = vmul.f32 %v457_v0, %v455_v1  ;;  %v474_v6 = vmul.f32 %v458_v4, %v456_v5  ;;  %566 = vmatprep.mubr.f32.mxu0 %v1875_v8  ;;  %v580_v9 = vld [vmem:[#allocation7 + $0x8] sm:$0xff]  ;;  %v582_v10 = vld [vmem:[#allocation7 + $0x18] sm:$0xff]  ;;  %v579_v11 = vld [vmem:[#allocation7] sm:$0xff]  ;;  %vm495_vm2 = vcmask 130048   ;;  %p441_p11 = scmp.lt.s32.totalorder %s1855_s27, 1  ;;  %s1305_s13 = sshll.u32 %s2175_s1, 5 }
  0xb2   : > { %481 = vrot.lane.b32.xlu0 %v477_v3, %s1874_s12  ;;  %v1419_v12 = vpack.c.bf16 %v582_v10, %v580_v9  ;;  %v581_v13 = vld [vmem:[#allocation7 + $0x10] sm:$0xff]  ;;  %v584_v14 = vld [vmem:[#allocation7 + $0x28] sm:$0xff]  ;;  %v586_v15 = vld [vmem:[#allocation7 + $0x38] sm:$0xff]  ;;  %s433_s15 = scalar_lea.vmem [#allocation13], %s1305_s13  ;;  %s1330_s17 = sshll.u32 %s1855_s27, 9 }
  0xb3   : > { %475 = vst.msk [vmem:[#allocation2 + $0x8] sm:$0xff] %vm459_vm0, %v473_v2  ;;  %476 = vst.msk [vmem:[#allocation2 + $0x18] sm:$0xff] %vm459_vm0, %v474_v6  ;;  %v1421_v16 = vpack.c.bf16 %v581_v13, %v579_v11  ;;  %v1423_v17 = vpack.c.bf16 %v586_v15, %v584_v14  ;;  %v583_v18 = vld [vmem:[#allocation7 + $0x20] sm:$0xff]  ;;  %v585_v19 = vld [vmem:[#allocation7 + $0x30] sm:$0xff]  ;;  %s442_s14 = scalar_select %p441_p11, %s1855_s27, 1 }
  0xb4   : > { %v588_v20 = vld [vmem:[#allocation7 + $0x48] sm:$0xff]  ;;  %1420 = vmatprep.subr.bf16.mxu1 %v1419_v12  ;;  %v590_v21 = vld [vmem:[#allocation7 + $0x58] sm:$0xff]  ;;  %v1425_v22 = vpack.c.bf16 %v585_v19, %v583_v18  ;;  %v587_v24 = vld [vmem:[#allocation7 + $0x40] sm:$0xff]  ;;  %s1117_s28 = sshll.u32 %s433_s15, 4  ;;  %s2355_s19 = sld [smem:[#allocation24_spill]]  ;;  %s2245_s28 = int_to_ptr.vmem [resolvable:$true] %s1117_s28 }
  0xb5   : > { %466 = vrot.lane.b32.xlu1 %v458_v4, %s1874_s12  ;;  %1422 = vmatpush1.bf16.msra.mxu1 %v1421_v16  ;;  %v1427_v23 = vpack.c.bf16 %v590_v21, %v588_v20  ;;  %v589_v25 = vld [vmem:[#allocation7 + $0x50] sm:$0xff]  ;;  %v592_v26 = vld [vmem:[#allocation7 + $0x68] sm:$0xff]  ;;  %v594_v27 = vld [vmem:[#allocation7 + $0x78] sm:$0xff]  ;;  %s1329_s7 = sshll.u32 %s442_s14, 5  ;;  %s2356_s26 = sld [smem:[#allocation28_spill]] }
  0xb6   : > { %483 = vrot.lane.b32.xlu0 %v478_v7, %s1874_s12  ;;  %1424 = vmatprep.subr.bf16.mxu1 %v1423_v17  ;;  %v1429_v28 = vpack.c.bf16 %v589_v25, %v587_v24  ;;  %v1431_v29 = vpack.c.bf16 %v594_v27, %v592_v26  ;;  %v591_v30 = vld [vmem:[#allocation7 + $0x60] sm:$0xff]  ;;  %v593_v31 = vld [vmem:[#allocation7 + $0x70] sm:$0xff]  ;;  %v596_v32 = vld [vmem:[#allocation7 + $0x88] sm:$0xff]  ;;  %s448_s8 = scalar_lea.vmem %s2305_s6, %s1329_s7  ;;  %s1102_s27 = scalar_lea.sflag [#allocation6], %s2175_s1 }
  0xb7   : > { %v598_v33 = vld [vmem:[#allocation7 + $0x98] sm:$0xff]  ;;  %v1433_v34 = vpack.c.bf16 %v593_v31, %v591_v30  ;;  %v595_v36 = vld [vmem:[#allocation7 + $0x80] sm:$0xff]  ;;  %v597_v37 = vld [vmem:[#allocation7 + $0x90] sm:$0xff]  ;;  %s1773_s30 = scalar_lea.vmem %s2245_s28, 512  ;;  %s1876_s9 = smov [#allocation13]  }
  0xb8   : > { %v1435_v35 = vpack.c.bf16 %v598_v33, %v596_v32  ;;  %v600_v38 = vld [vmem:[#allocation7 + $0xa8] sm:$0xff]  ;;  %v602_v39 = vld [vmem:[#allocation7 + $0xb8] sm:$0xff]  ;;  %v1437_v40 = vpack.c.bf16 %v597_v37, %v595_v36  ;;  %v599_v42 = vld [vmem:[#allocation7 + $0xa0] sm:$0xff]  ;;  %p1774_p6 = scmp.ne.s32.totalorder %s2245_s28, %s1773_s30  ;;  %s1777_s24 = sshll.u32 %s1876_s9, 4  ;;  %s1778_s24 = int_to_ptr.vmem [resolvable:$false] %s1777_s24 }
  0xb9   : > { %1426 = vmatpush1.bf16.msra.mxu1 %v1425_v22  ;;  %v1439_v41 = vpack.c.bf16 %v602_v39, %v600_v38  ;;  %v601_v43 = vld [vmem:[#allocation7 + $0xb0] sm:$0xff]  ;;  %v604_v44 = vld [vmem:[#allocation7 + $0xc8] sm:$0xff]  ;;  %v606_v45 = vld [vmem:[#allocation7 + $0xd8] sm:$0xff]  ;;  %s1779_s10 = scalar_lea.vmem %s1778_s24, 1024  ;;  %p1780_p1 = scmp.lt.s32.totalorder %s2245_s28, %s1778_s24 }
  0xba   : > { %1428 = vmatprep.subr.bf16.mxu1 %v1427_v23  ;;  %v1441_v46 = vpack.c.bf16 %v601_v43, %v599_v42  ;;  %v1443_v47 = vpack.c.bf16 %v606_v45, %v604_v44  ;;  %v603_v48 = vld [vmem:[#allocation7 + $0xc0] sm:$0xff]  ;;  %v605_v49 = vld [vmem:[#allocation7 + $0xd0] sm:$0xff]  ;;  %v608_v50 = vld [vmem:[#allocation7 + $0xe8] sm:$0xff]  ;;  %p2358_p10 = scmp.ne.s32.totalorder %s2355_s19, 0  ;;  %p1781_p12 = scmp.lt.s32.totalorder %s1779_s10, %s1773_s30 }
  0xbb   : > { %v610_v51 = vld [vmem:[#allocation7 + $0xf8] sm:$0xff]  ;;  %v1445_v52 = vpack.c.bf16 %v605_v49, %v603_v48  ;;  %v607_v54 = vld [vmem:[#allocation7 + $0xe0] sm:$0xff]  ;;  %v609_v55 = vld [vmem:[#allocation7 + $0xf0] sm:$0xff]  ;;  %s2250_s29 = scalar_lea.hbm %s2356_s26, %s1330_s17 }
  0xbc   : > { %v1447_v53 = vpack.c.bf16 %v610_v51, %v608_v50  ;;  %v612_v56 = vld [vmem:[#allocation7 + $0x108] sm:$0xff]  ;;  %v614_v57 = vld [vmem:[#allocation7 + $0x118] sm:$0xff]  ;;  %v1449_v58 = vpack.c.bf16 %v609_v55, %v607_v54  ;;  %v611_v60 = vld [vmem:[#allocation7 + $0x100] sm:$0xff]  ;;  %p1775_p13 = pnand %p1774_p6, %p2358_p10  ;;  %p1782_p0 = por %p1781_p12, %p1780_p1 }
  0xbd   : > { %1430 = vmatpush1.bf16.msra.mxu1 %v1429_v28  ;;  %v1451_v59 = vpack.c.bf16 %v614_v57, %v612_v56  ;;  %v613_v61 = vld [vmem:[#allocation7 + $0x110] sm:$0xff]  ;;  %v616_v62 = vld [vmem:[#allocation7 + $0x128] sm:$0xff]  ;;  %v618_v63 = vld [vmem:[#allocation7 + $0x138] sm:$0xff] }
  0xbe   : > { %1432 = vmatprep.subr.bf16.mxu1 %v1431_v29  ;;  %v1453_v0 = vpack.c.bf16 %v613_v61, %v611_v60  ;;  %v1455_v1 = vpack.c.bf16 %v618_v63, %v616_v62  ;;  %v615_v2 = vld [vmem:[#allocation7 + $0x120] sm:$0xff]  ;;  %v617_v3 = vld [vmem:[#allocation7 + $0x130] sm:$0xff]  ;;  %v620_v4 = vld [vmem:[#allocation7 + $0x148] sm:$0xff]  ;;  %p1776_p7 = pneg %p1775_p13 }
  0xbf   : > { %v622_v5 = vld [vmem:[#allocation7 + $0x158] sm:$0xff]  ;;  %v1457_v6 = vpack.c.bf16 %v617_v3, %v615_v2  ;;  %v619_v9 = vld [vmem:[#allocation7 + $0x140] sm:$0xff]  ;;  %v621_v10 = vld [vmem:[#allocation7 + $0x150] sm:$0xff] }
  0xc0   : > { %v1459_v7 = vpack.c.bf16 %v622_v5, %v620_v4  ;;  %v624_v11 = vld [vmem:[#allocation7 + $0x168] sm:$0xff]  ;;  %v626_v12 = vld [vmem:[#allocation7 + $0x178] sm:$0xff]  ;;  %v1461_v13 = vpack.c.bf16 %v621_v10, %v619_v9  ;;  %v623_v15 = vld [vmem:[#allocation7 + $0x160] sm:$0xff]  ;;  %p1783_p8 = pnand %p1782_p0, %p1776_p7 }
  0xc1   : > { %1434 = vmatpush1.bf16.msra.mxu1 %v1433_v34  ;;  %v1463_v14 = vpack.c.bf16 %v626_v12, %v624_v11  ;;  %v625_v16 = vld [vmem:[#allocation7 + $0x170] sm:$0xff]  ;;  %v628_v17 = vld [vmem:[#allocation7 + $0x188] sm:$0xff]  ;;  %v630_v18 = vld [vmem:[#allocation7 + $0x198] sm:$0xff] }
  0xc2   : > { %1436 = vmatprep.subr.bf16.mxu1 %v1435_v35  ;;  %v1465_v19 = vpack.c.bf16 %v625_v16, %v623_v15  ;;  %v1467_v20 = vpack.c.bf16 %v630_v18, %v628_v17  ;;  %v627_v21 = vld [vmem:[#allocation7 + $0x180] sm:$0xff]  ;;  %v629_v22 = vld [vmem:[#allocation7 + $0x190] sm:$0xff]  ;;  %v632_v23 = vld [vmem:[#allocation7 + $0x1a8] sm:$0xff] }
  0xc3   : > { %v634_v24 = vld [vmem:[#allocation7 + $0x1b8] sm:$0xff]  ;;  %v1469_v25 = vpack.c.bf16 %v629_v22, %v627_v21  ;;  %v631_v27 = vld [vmem:[#allocation7 + $0x1a0] sm:$0xff]  ;;  %v633_v28 = vld [vmem:[#allocation7 + $0x1b0] sm:$0xff] }
  0xc4   : > { %v1471_v26 = vpack.c.bf16 %v634_v24, %v632_v23  ;;  %v636_v29 = vld [vmem:[#allocation7 + $0x1c8] sm:$0xff]  ;;  %v638_v30 = vld [vmem:[#allocation7 + $0x1d8] sm:$0xff]  ;;  %v1473_v31 = vpack.c.bf16 %v633_v28, %v631_v27  ;;  %v635_v33 = vld [vmem:[#allocation7 + $0x1c0] sm:$0xff] }
  0xc5   : > { %1438 = vmatpush1.bf16.msra.mxu1 %v1437_v40  ;;  %v1475_v32 = vpack.c.bf16 %v638_v30, %v636_v29  ;;  %v637_v34 = vld [vmem:[#allocation7 + $0x1d0] sm:$0xff]  ;;  %v640_v35 = vld [vmem:[#allocation7 + $0x1e8] sm:$0xff]  ;;  %v642_v36 = vld [vmem:[#allocation7 + $0x1f8] sm:$0xff] }
  0xc6   : > { %1440 = vmatprep.subr.bf16.mxu1 %v1439_v41  ;;  %v1477_v37 = vpack.c.bf16 %v637_v34, %v635_v33  ;;  %v1479_v38 = vpack.c.bf16 %v642_v36, %v640_v35  ;;  %v489_v49 = vld [vmem:[#allocation4] sm:$0xff]  ;;  %v490_v50 = vld [vmem:[#allocation4 + $0x8] sm:$0xff]  ;;  %v639_v51 = vld [vmem:[#allocation7 + $0x1e0] sm:$0xff] }
  0xc7   : > { %v775_v33 = vld [vmem:[%s2301_s2 + $0x8] sm:$0xff]  ;;  %v776_v34 = vld [vmem:[%s2301_s2 + $0x10] sm:$0xff]  ;;  %v882_v36 = vld [vmem:[#allocation9 + $0x20] sm:$0xff] }
  0xc9   : > { %1442 = vmatpush1.bf16.msra.mxu1 %v1441_v46 }
  0xca   : > { %1444 = vmatprep.subr.bf16.mxu1 %v1443_v47 }
  0xcd   : > { %1446 = vmatpush1.bf16.msra.mxu1 %v1445_v52  ;;  %v641_v52 = vld [vmem:[#allocation7 + $0x1f0] sm:$0xff] }
  0xce   : > { %1448 = vmatprep.subr.bf16.mxu1 %v1447_v53  ;;  %v1481_v53 = vpack.c.bf16 %v641_v52, %v639_v51 }
  0xd1   : > { %1450 = vmatpush1.bf16.msra.mxu1 %v1449_v58 }
  0xd2   : > { %1452 = vmatprep.subr.bf16.mxu1 %v1451_v59 }
  0xd5   : > { %1454 = vmatpush1.bf16.msra.mxu1 %v1453_v0 }
  0xd6   : > { %1456 = vmatprep.subr.bf16.mxu1 %v1455_v1 }
  0xd9   : > { %1458 = vmatpush1.bf16.msra.mxu1 %v1457_v6 }
  0xda   : > { %1460 = vmatprep.subr.bf16.mxu1 %v1459_v7 }
  0xdd   : > { %1462 = vmatpush1.bf16.msra.mxu1 %v1461_v13 }
  0xde   : > { %1464 = vmatprep.subr.bf16.mxu1 %v1463_v14 }
  0xe1   : > { %1466 = vmatpush1.bf16.msra.mxu1 %v1465_v19 }
  0xe2   : > { %1468 = vmatprep.subr.bf16.mxu1 %v1467_v20  ;;  %v774_v20 = vld [vmem:[%s2301_s2] sm:$0xff] }
  0xe5   : > { %1470 = vmatpush1.bf16.msra.mxu1 %v1469_v25  ;;  %v878_v25 = vld [vmem:[#allocation9] sm:$0xff] }
  0xe6   : > { %1472 = vmatprep.subr.bf16.mxu1 %v1471_v26  ;;  %v879_v26 = vld [vmem:[#allocation9 + $0x8] sm:$0xff] }
  0xe7   : > { %v1487_v30 = vpack.c.bf16 %v879_v26, %v878_v25 }
  0xe9   : > { %1474 = vmatpush1.bf16.msra.mxu1 %v1473_v31  ;;  %v880_v31 = vld [vmem:[#allocation9 + $0x10] sm:$0xff] }
  0xea   : > { %1476 = vmatprep.subr.bf16.mxu1 %v1475_v32  ;;  %v881_v32 = vld [vmem:[#allocation9 + $0x18] sm:$0xff] }
  0xeb   : > { %v1491_v35 = vpack.c.bf16 %v881_v32, %v880_v31 }
  0xed   : > { %1478 = vmatpush1.bf16.msra.mxu1 %v1477_v37  ;;  %v883_v37 = vld [vmem:[#allocation9 + $0x28] sm:$0xff] }
  0xee   : > { %1480 = vmatprep.subr.bf16.mxu1 %v1479_v38  ;;  %v777_v38 = vld [vmem:[%s2301_s2 + $0x18] sm:$0xff] }
  0xf1   : > { %1482 = vmatpush1.bf16.msra.mxu1 %v1481_v53 }
 0x123   : > { %v465_v39 = vpop.permute.xlu1 %464 }
 0x124   : > { %471 = vst.msk [vmem:[#allocation2] sm:$0xff] %vm470_vm1, %v465_v39  ;;  %v482_v40 = vpop.permute.xlu0 %481  ;;  %v1495_v39 = vpack.c.bf16 %v883_v37, %v882_v36 }
 0x125   : > { %487 = vst.msk [vmem:[#allocation2 + $0x8] sm:$0xff] %vm470_vm1, %v482_v40  ;;  %v884_v40 = vld [vmem:[#allocation9 + $0x30] sm:$0xff] }
 0x127   : > { %v467_v41 = vpop.permute.xlu1 %466 }
 0x128   : > { %472 = vst.msk [vmem:[#allocation2 + $0x10] sm:$0xff] %vm470_vm1, %v467_v41  ;;  %v484_v42 = vpop.permute.xlu0 %483  ;;  %v885_v41 = vld [vmem:[#allocation9 + $0x38] sm:$0xff] }
 0x129   : > { %488 = vst.msk [vmem:[#allocation2 + $0x18] sm:$0xff] %vm470_vm1, %v484_v42  ;;  %v1499_v42 = vpack.c.bf16 %v885_v41, %v884_v40 }
 0x12b   : > { %v491_v43 = vld [vmem:[#allocation2] sm:$0xff] }
 0x12c   : > { %v492_v45 = vld [vmem:[#allocation2 + $0x8] sm:$0xff] }
 0x12f   : > { %v493_v44 = vld [vmem:[#allocation2 + $0x10] sm:$0xff] }
 0x130   : > { %v494_v46 = vld [vmem:[#allocation2 + $0x18] sm:$0xff]  ;;  %v1417_v48 = vpack.c.bf16 %v493_v44, %v491_v43 }
 0x131   : > { %v1415_v47 = vpack.c.bf16 %v494_v46, %v492_v45 }
 0x133   : > { %1416 = vmatprep.subr.bf16.mxu0 %v1415_v47 }
 0x134   : > { %1418 = vmatpush1.bf16.msra.mxu0 %v1417_v48 }
 0x137   : > { %1308 = vmatmul.mubr.msk.f32.vlgmr.msra.gmra.mrb[0].mxu0 %vm495_vm2, %v489_v49 }
 0x138   : > { %572 = vmatprep.mubr.f32.mxu0 %v1875_v8 }
 0x13b   : > { %1309 = vmatmul.mubr.msk.f32.gmra.mrb[2].mxu0 %vm495_vm2, %v490_v50 }
 0x13c   : > { %1365 = vmatprep.mubr.msk.f32.mxu0 %vm495_vm2, %v774_v20 }
 0x20a   : > { %v568_v54 = vpop.f32.mrb[0].mxu0 }
 0x20b   : > { %v570_v55 = vpop.f32.mrb[1].mxu0 }
 0x20c   : > { %707 = vmatprep.mubr.f32.mxu1 %v570_v55  ;;  %v1086_v55 = vld [vmem:[%s448_s8 + $0x8] sm:$0xff] }
 0x20d   : > { %708 = vmatmul.mubr.f32.vlgmr.msra.gmra.mrb[0].mxu1 %v568_v54 }
 0x20e   : > { %v574_v56 = vpop.f32.mrb[2].mxu0 }
 0x20f   : > { %v576_v57 = vpop.f32.mrb[3].mxu0 }
 0x210   : > { %713 = vmatprep.mubr.f32.mxu1 %v576_v57 }
 0x211   : > { %714 = vmatmul.mubr.f32.gmra.mrb[2].mxu1 %v574_v56  ;;  %v1085_v56 = vld [vmem:[%s448_s8] sm:$0xff] }
 0x2e0   : > { %v709_v58 = vpop.f32.mrb[0].mxu1 }
 0x2e1   : > { %v711_v59 = vpop.f32.mrb[1].mxu1  ;;  %v732_v60 = vmul.f32 %v709_v58, %v709_v58 }
 0x2e3   : > { %736 = vrot.lane.b32.xlu0 %v732_v60, %s1874_s12 }
 0x2e4   : > { %v715_v8 = vpop.f32.mrb[2].mxu1 }
 0x2e5   : > { %v717_v61 = vpop.f32.mrb[3].mxu1  ;;  %v733_v62 = vmul.f32 %v715_v8, %v715_v8 }
 0x2e7   : > { %738 = vrot.lane.b32.xlu1 %v733_v62, %s1874_s12 }
 0x355   : > { %v737_v63 = vpop.permute.xlu0 %736 }
 0x356   : > { %v742_v0 = vsub.f32 %v711_v59, %v737_v63 }
 0x358   : > { %v744_v1 = vadd.f32 1e-08, %v742_v0 }
 0x359   : > { %v739_v2 = vpop.permute.xlu1 %738 }
 0x35a   : > { %v743_v3 = vsub.f32 %v717_v61, %v739_v2  ;;  %748 = vrot.lane.b32.xlu0 %v744_v1, %s1874_s12 }
 0x35c   : > { %v745_v4 = vadd.f32 1e-08, %v743_v3 }
 0x35e   : > { %722 = vrot.lane.b32.xlu0 %v709_v58, %s1874_s12  ;;  %750 = vrot.lane.b32.xlu1 %v745_v4, %s1874_s12 }
 0x362   : > { %724 = vrot.lane.b32.xlu1 %v715_v8, %s1874_s12 }
 0x3cc   : > { %v749_v5 = vpop.permute.xlu0 %748 }
 0x3cd   : > { %1625 = vrcp.f32 %v749_v5 }
 0x3d0   : > { %v723_v6 = vpop.permute.xlu0 %722  ;;  %v751_v7 = vpop.permute.xlu1 %750 }
 0x3d1   : > { %v728_v9 = vmul.f32 %v723_v6, %v709_v58  ;;  %1627 = vrcp.f32 %v751_v7 }
 0x3d3   : > { %v730_v10 = vsub.f32 %v711_v59, %v728_v9  ;;  %v1088_v59 = vld [vmem:[%s448_s8 + $0x18] sm:$0xff] }
 0x3d4   : > { %v725_v11 = vpop.permute.xlu1 %724 }
 0x3d5   : > { %v729_v12 = vmul.f32 %v725_v11, %v715_v8 }
 0x3d7   : > { %v1626_v13 = vpop.eup %1625  ;;  %v731_v14 = vsub.f32 %v717_v61, %v729_v12 }
 0x3d8   : > { %v755_v15 = vmul.f32 %v1626_v13, %v730_v10 }
 0x3da   : > { %770 = vst.msk [vmem:[#allocation3] sm:$0xff] %vm459_vm0, %v755_v15  ;;  %v758_v16 = vmul.f32 %v755_v15, %v709_v58 }
 0x3db   : > { %v1628_v17 = vpop.eup %1627 }
 0x3dc   : > { %v757_v18 = vmul.f32 %v1628_v17, %v731_v14  ;;  %762 = vrot.lane.b32.xlu0 %v758_v16, %s1874_s12 }
 0x3de   : > { %771 = vst.msk [vmem:[#allocation3 + $0x8] sm:$0xff] %vm459_vm0, %v757_v18  ;;  %v759_v19 = vmul.f32 %v757_v18, %v715_v8 }
 0x3e0   : > { %764 = vrot.lane.b32.xlu1 %v759_v19, %s1874_s12 }
 0x44e   : > { %v763_v21 = vpop.permute.xlu0 %762 }
 0x44f   : > { %v768_v22 = vsub.f32 %v709_v58, %v763_v21 }
 0x451   : > { %772 = vst.msk [vmem:[#allocation3] sm:$0xff] %vm470_vm1, %v768_v22 }
 0x452   : > { %v765_v23 = vpop.permute.xlu1 %764 }
 0x453   : > { %v769_v24 = vsub.f32 %v715_v8, %v765_v23  ;;  %v1087_v8 = vld [vmem:[%s448_s8 + $0x10] sm:$0xff] }
 0x455   : > { %773 = vst.msk [vmem:[#allocation3 + $0x8] sm:$0xff] %vm470_vm1, %v769_v24 }
 0x458   : > { %v778_v27 = vld [vmem:[#allocation3] sm:$0xff] }
 0x45c   : > { %v779_v28 = vld [vmem:[#allocation3 + $0x8] sm:$0xff] }
 0x45d   : > { %v1483_v29 = vpack.c.bf16 %v779_v28, %v778_v27 }
 0x45f   : > { %1484 = vmatprep.subr.bf16.mxu0 %v1483_v29 }
 0x460   : > { %1486 = vmatpush3.bf16.msra.mxu0 %v1483_v29 }
 0x461   : > { %1488 = vmatprep.subr.bf16.mxu0 %v1487_v30 }
 0x463   : > { %1366 = vmatmul.mubr.msk.f32.vlgmr.msra.gmra.mrb[4].mxu0 %vm495_vm2, %v775_v33 }
 0x464   : > { %1368 = vmatprep.mubr.msk.f32.mxu0 %vm495_vm2, %v776_v34  ;;  %1490 = vmatpush3.bf16.msra.mxu0 %v1487_v30 }
 0x465   : > { %1492 = vmatprep.subr.bf16.mxu0 %v1491_v35 }
 0x467   : > { %1369 = vmatmul.mubr.msk.f32.gmra.mrb[6].mxu0 %vm495_vm2, %v777_v38 }
 0x468   : > { %1494 = vmatpush3.bf16.msra.mxu0 %v1491_v35 }
 0x469   : > { %1496 = vmatprep.subr.bf16.mxu0 %v1495_v39 }
 0x46c   : > { %1498 = vmatpush3.bf16.msra.mxu0 %v1495_v39 }
 0x46d   : > { %1500 = vmatprep.subr.bf16.mxu0 %v1499_v42 }
 0x470   : > { %1502 = vmatpush3.bf16.msra.mxu0 %v1499_v42 }
 0x471   : > { %1504 = vmatprep.subr.bf16.mxu0 %v1487_v30 }
 0x536   : > { %v1367_v43 = vpop.f32.mrb[4].mxu0 }
 0x537   : > { %v859_v44 = vpop.f32.mrb[5].mxu0  ;;  %986 = vrot.lane.b32.xlu1 %v1367_v43, %s1874_s12 }
 0x538   : > { %984 = vrot.lane.b32.xlu0 %v859_v44, %s1874_s12  ;;  %1387 = vmatprep.mubr.msk.f32.mxu0 %vm459_vm0, %v859_v44 }
 0x539   : > { %1388 = vmatmul.mubr.msk.f32.vlgmr.msra.gmra.mrb[8].mxu0 %vm459_vm0, %v1367_v43 }
 0x53a   : > { %v1370_v45 = vpop.f32.mrb[6].mxu0  ;;  %1506 = vmatpush3.bf16.msra.mxu0 %v1487_v30 }
 0x53b   : > { %v869_v46 = vpop.f32.mrb[7].mxu0  ;;  %990 = vrot.lane.b32.xlu1 %v1370_v45, %s1874_s12  ;;  %1508 = vmatprep.subr.bf16.mxu0 %v1491_v35 }
 0x53c   : > { %988 = vrot.lane.b32.xlu0 %v869_v46, %s1874_s12  ;;  %1390 = vmatprep.mubr.msk.f32.mxu0 %vm459_vm0, %v869_v46  ;;  %s2357_s12 = smov %s2356_s26 }
 0x53d   : > { %1391 = vmatmul.mubr.msk.f32.gmra.mrb[10].mxu0 %vm459_vm0, %v1370_v45 }
 0x53e   : > { %1510 = vmatpush3.bf16.msra.mxu0 %v1491_v35 }
 0x53f   : > { %1512 = vmatprep.subr.bf16.mxu0 %v1495_v39 }
 0x542   : > { %1514 = vmatpush3.bf16.msra.mxu0 %v1495_v39 }
 0x543   : > { %1516 = vmatprep.subr.bf16.mxu0 %v1499_v42 }
 0x546   : > { %1518 = vmatpush3.bf16.msra.mxu0 %v1499_v42 }
 0x5a9   : > { %v987_v47 = vpop.permute.xlu1 %986 }
 0x5aa   : > { %v985_v48 = vpop.permute.xlu0 %984 }
 0x5ab   : > { %1409 = vmatprep.mubr.msk.f32.mxu0 %vm459_vm0, %v985_v48 }
 0x5ac   : > { %1410 = vmatmul.mubr.msk.f32.vlgmr.msra.gmra.mrb[12].mxu0 %vm459_vm0, %v987_v47 }
 0x5ad   : > { %v991_v50 = vpop.permute.xlu1 %990 }
 0x5ae   : > { %v989_v49 = vpop.permute.xlu0 %988 }
 0x5af   : > { %1412 = vmatprep.mubr.msk.f32.mxu0 %vm459_vm0, %v989_v49 }
 0x5b0   : > { %1413 = vmatmul.mubr.msk.f32.gmra.mrb[14].mxu0 %vm459_vm0, %v991_v50 }
 0x60c   : > { %v1389_v51 = vpop.f32.mrb[8].mxu0 }
 0x60d   : > { %v965_v52 = vpop.f32.mrb[9].mxu0  ;;  %v1090_v57 = vmul.f32 %v1389_v51, %v1086_v55 }
 0x60e   : > { %v1089_v58 = vmul.f32 %v1085_v56, %v965_v52 }
 0x610   : > { %v1392_v53 = vpop.f32.mrb[10].mxu0 }
 0x611   : > { %v975_v54 = vpop.f32.mrb[11].mxu0  ;;  %v1092_v0 = vmul.f32 %v1392_v53, %v1088_v59 }
 0x612   : > { %v1091_v1 = vmul.f32 %v1087_v8, %v975_v54 }
 0x67f   : > { %v1411_v60 = vpop.f32.mrb[12].mxu0 }
 0x680   : > { %v1094_v61 = vadd.f32 %v1411_v60, %v1090_v57  ;;  %v1066_v62 = vpop.f32.mrb[13].mxu0 }
 0x681   : > { %v1093_v63 = vadd.f32 %v1089_v58, %v1066_v62 }
 0x682   : > { %1098 = vst [vmem:[%s433_s15 + $0x8] sm:$0xff] %v1094_v61 }
 0x683   : > { %1097 = vst [vmem:[%s433_s15] sm:$0xff] %v1093_v63  ;;  %v1414_v2 = vpop.f32.mrb[14].mxu0 }
 0x684   : > { %v1096_v3 = vadd.f32 %v1414_v2, %v1092_v0  ;;  %v1076_v4 = vpop.f32.mrb[15].mxu0 }
 0x685   : > { %v1095_v5 = vadd.f32 %v1091_v1, %v1076_v4 }
 0x686   : > { %1100 = vst [vmem:[%s433_s15 + $0x18] sm:$0xff] %v1096_v3 }
 0x687   : > { %1099 = vst [vmem:[%s433_s15 + $0x10] sm:$0xff] %v1095_v5 }
 0x688   : > { %1786 = shalt.err (!%p1783_p8)
}
 0x689   : > { %s1787_s20 = scalar_lea.hbm %s2250_s29, 512  ;;  %s1791_s21 = scalar_lea.hbm %s2357_s12, 1024 }
 0x68a   : > { %p1788_p5 = scmp.ne.s32.totalorder %s2250_s29, %s1787_s20  ;;  %p1792_p4 = scmp.lt.u32.totalorder %s2250_s29, %s2357_s12 }
 0x68b   : > { %p1793_p3 = scmp.lt.u32.totalorder %s1791_s21, %s1787_s20  ;;  %p1795_p6 = scmp.lt.u32.totalorder %s1787_s20, %s2250_s29 }
 0x68c   : > { %p1789_p9 = pnand %p1788_p5, %p2358_p10 }
 0x68d   : > { %p1794_p11 = por %p1793_p3, %p1792_p4 }
 0x68e   : > { %p1790_p2 = pneg %p1789_p9 }
 0x68f   : > { %p1796_p13 = por %p1795_p6, %p1794_p11 }
 0x691   : > { %p1797_p7 = pnand %p1796_p13, %p1790_p2 }
 0x693   : > { %1800 = shalt.err (!%p1797_p7)
}
 0x694   : > { %s1877_s4 = smov 128   ;;  %s1878_s22 = smov 8  }
 0x695   : > { %1535 = dma.vmem_to_hbm [thread:$0]  (%p2358_p10), %s2245_s28, 512, %s2250_s29, %s1102_s27, %s1877_s4, %s1877_s4, %s1878_s22  }
 0x696 PF: > { %s2359_s8 = sld [smem:[#allocation18_spill]]  ;;  %s2360_s13 = sld [smem:[#allocation22_spill]] }
 0x697   : > { %s2361_s15 = sld [smem:[#allocation21_spill]] }
 0x69c   : > { %s1132_s17 = sand.u32 1, %s2359_s8   ;;  %p2362_p1 = scmp.ne.s32.totalorder %s2360_s13, 0 }
 0x69d   : > { %p2363_p12 = scmp.ge.s32.totalorder %s2361_s15, 2  ;;  %s1133_s11 = scalar_lea.sflag [#allocation6], %s1132_s17 }
 0x69f   : > { %p1555_p0 = pnand %p2363_p12, %p2362_p1 }
 0x6a1   : > { %1838 = dma.done.wait (!%p1555_p0), %s1133_s11, 512  }
 0x6a2   : > { %1840 = vsyncadd (!%p1555_p0), %s1133_s11, 4294966784  ;;  %s25_s29 = sadd.s32 1, %s2361_s15   ;;  %s2364_s18 = sld [smem:[#allocation19_spill]] }
 0x6a3   : > { %p22_p8 = scmp.ge.s32.totalorder %s25_s29, 4   ;;  %s2365_s26 = sld [smem:[#allocation25_spill]] }
 0x6a4   : > { %s2366_s27 = sld [smem:[#allocation20_spill]]  ;;  %s2367_s28 = sld [smem:[#allocation23_spill]] }
 0x6a5   : > { %s2368_s24 = smov %s1847_s25  ;;  %24 = sbr.rel (!%p22_p8) target bundleno = 12 (0xc), region = 127 }
 0x6a8   : > { %s2369_s25 = smov %s2364_s18 }
 0x6ac   :  { %1138 = vsyncpa [#allocation5], 1 }
 0x6ad   :  { %1140 = vsyncpa [#allocation5 + $0x1], 1 }
 0x6ae   :  { %1141 = vsyncpa [#allocation8], 1 }
 0x6af   :  { %1142 = vsyncpa [#allocation11], 1 }
 0x6b0   :  { %1144 = vsyncpa [#allocation11 + $0x1], 1 }
 0x6b1   :  { %1145 = vsyncpa [#allocation6], 1 }
 0x6b2   :  { %1147 = vsyncpa [#allocation6 + $0x1], 1 }

</bundles_post_ra>
